<compile_context>
chip_gen: v7x
topology: tpu7x:2x2x1
jax: 0.10.0
libtpu: 0.0.40
codegen_flags: <defaults>
</compile_context>

<pallas_src>
import functools

import jax
import jax.numpy as jnp
from jax.experimental import pallas as pl
from jax.experimental.pallas import tpu as pltpu

_MAX_NB = 32  # bound the in-kernel unroll (lane-merge concat + per-example stores)


# ----------------------------------------------------------------------------- kernel


def _conv_bn_lrelu_kernel(x_ref, w_ref, shift_ref, o_ref, *,
                          K, pad, C_in, C_out, Nb, L, neg_slope):
    # x_ref:     (Nb, C_in, L)       unpadded input block (Nb batch elements)
    # w_ref:     (C_out, K*C_in)     conv weights with BN scale folded in; col k*C_in+ci = w[:,ci,k]
    # shift_ref: (C_out, 1)          folded shift: beta + scale * (conv_bias - running_mean), f32
    # o_ref:     (Nb, C_out, L)
    LT = Nb * L

    # Lane-merge the Nb examples into one (C_in, Nb*L) slab (lane-dense MXU operand).
    if Nb > 1:
        x2 = jnp.concatenate([x_ref[i] for i in range(Nb)], axis=1)
    else:
        x2 = x_ref[0]

    # Within-example position on the lane axis, shape (1, LT): zeroes the 'same'-padding halo
    # and any cross-example bleed introduced by the lane roll.  Kept at a single sublane row
    # (broadcast inside the selects) so the per-step iota/mod/compare work is 1/C_in of v1.
    t = jax.lax.broadcasted_iota(jnp.int32, (1, LT), 1) % L

    # Stacked shifted window: row k*C_in + ci holds x[ci, t + k - pad] (zero outside [0, L)).
    taps = []
    for k in range(K):
        d = k - pad
        if d == 0:
            taps.append(x2)
        else:
            xs = pltpu.roll(x2, (-d) % LT, 1)          # XLU lane rotate: xs[:, t] = x2[:, t + d]
            valid = (t < L - d) if d > 0 else (t >= -d)
            taps.append(jnp.where(valid, xs, 0))
    xk = jnp.concatenate(taps, axis=0)                 # (K*C_in, Nb*L)

    # Single MXU contraction over all taps and input channels (f32 MXU-internal accumulation).
    y = jnp.dot(w_ref[...], xk, preferred_element_type=jnp.float32)   # (C_out, Nb*L) f32
    y = y + shift_ref[...]                             # conv bias + BatchNorm1d (eval), folded
    y = jnp.where(y >= 0, y, neg_slope * y)            # LeakyReLU(0.01)
    # Dropout(p=0.1) in eval mode == identity.
    for i in range(Nb):                                # lane-aligned slices when L % 128 == 0
        o_ref[i] = y[:, i * L:(i + 1) * L].astype(o_ref.dtype)


# ----------------------------------------------------------------------------- planning


def _chip_vmem_bytes():
    """Physical VMEM of the local chip; conservative (v7x-sized) fallback if unavailable."""
    try:
        info = pltpu.get_tpu_info()
        for attr in ("vmem_capacity_bytes", "vmem_size_bytes", "vmem_bytes"):
            v = getattr(info, attr, None)
            if v:
                return int(v)
    except Exception:
        pass
    return 64 << 20


def _plan_blocks(N, C_in, C_out, L, bytes_io, K):
    """Choose Nb (batch elements fused per grid step) and the padded batch size.

    The VMEM model counts the double-buffered in/out blocks AND the in-kernel intermediates
    (lane-merged copy, K taps, stacked xk, f32 accumulator), per the perf review.  On
    single-TC chips (v5e/v6e, 128 MiB VMEM) a single maximal step is allowed; on 2-TC chips
    (v7x, 64 MiB/TC) the step count is kept even (>= 2) so the megacore split balances.
    """
    phys = _chip_vmem_bytes()
    single_core = phys > (96 << 20)                    # v5e/v6e: 128 MiB & 1 TC; v7x: 64 MiB & 2 TCs
    budget = (64 << 20) if single_core else (40 << 20)

    def step_bytes(nb):
        lt = nb * L
        return (2 * nb * C_in * L * bytes_io           # double-buffered input block
                + 2 * nb * C_out * L * bytes_io        # double-buffered output block
                + 2 * C_out * K * C_in * bytes_io      # resident weight block
                + C_in * lt * bytes_io                 # lane-merged x2 copy
                + 2 * K * C_in * lt * bytes_io         # K taps + stacked xk
                + C_out * lt * 4                       # f32 MXU accumulator / epilogue
                + lt * 8)                              # iota + masks

    nb_max = 1
    while nb_max < min(N, _MAX_NB) and step_bytes(nb_max + 1) <= budget:
        nb_max += 1

    steps = -(-N // nb_max)                            # as few grid steps as VMEM allows
    if not single_core and N > 1:
        steps = max(steps, 2)                          # give both TensorCores work
        if steps % 2:
            steps += 1                                 # balanced megacore split
    nb = -(-N // steps)                                # exact divisor when one exists
    n_pad = steps * nb
    return nb, n_pad, single_core, step_bytes(nb)


# ----------------------------------------------------------------------------- wrapper


def convolution_layer(x, w, b, gamma, beta, run_mean, run_var, *,
                      eps=1e-5, neg_slope=0.01, compute_dtype=jnp.bfloat16):
    """x: (N, C_in, L).  w: (C_out, C_in, K) (PyTorch Conv1d layout).  Returns (N, C_out, L).

    compute_dtype (default bf16) is used for x, the folded weights AND the output, so both
    read and write HBM traffic are halved; pass compute_dtype=None to keep the input dtype.
    """
    N, C_in, L = x.shape
    C_out, _, K = w.shape
    assert K % 2 == 1, "padding='same' implemented for odd kernel_size (module default K=5)"
    pad = (K - 1) // 2

    # Glue (plain JAX): fold BN scale into the conv weights, and BN shift + conv bias into
    # one per-channel shift (kept f32 for accuracy).
    scale = gamma / jnp.sqrt(run_var + eps)                            # (C_out,)
    w2 = jnp.transpose(w, (0, 2, 1)).reshape(C_out, K * C_in)          # col k*C_in+ci = w[:,ci,k]
    w2 = (w2 * scale[:, None]).astype(jnp.float32)
    shift2 = (beta + scale * (b - run_mean)).reshape(C_out, 1).astype(jnp.float32)

    if compute_dtype is not None:
        # No-op if x already arrives in compute_dtype (e.g. bf16 activations upstream).
        x = x.astype(compute_dtype)
        w2 = w2.astype(compute_dtype)
    out_dtype = x.dtype                                # AFTER the cast: write-back also narrow

    bytes_io = jnp.dtype(x.dtype).itemsize
    Nb, n_pad, single_core, need = _plan_blocks(N, C_in, C_out, L, bytes_io, K)
    if n_pad != N:
        x = jnp.pad(x, ((0, n_pad - N), (0, 0), (0, 0)))   # tail rows dropped after the call

    vmem_cap = (100 << 20) if single_core else (56 << 20)
    vmem_limit = int(min(vmem_cap, max(32 << 20, 2 * need)))

    flops = 2 * C_out * K * C_in * n_pad * L
    bytes_accessed = (n_pad * C_in * L * bytes_io + n_pad * C_out * L * bytes_io
                      + w2.size * bytes_io + shift2.size * 4)

    kernel = functools.partial(_conv_bn_lrelu_kernel, K=K, pad=pad, C_in=C_in,
                               C_out=C_out, Nb=Nb, L=L, neg_slope=neg_slope)

    out = pl.pallas_call(
        kernel,
        out_shape=jax.ShapeDtypeStruct((n_pad, C_out, L), out_dtype),
        grid_spec=pltpu.PrefetchScalarGridSpec(
            num_scalar_prefetch=0,
            grid=(n_pad // Nb,),
            in_specs=[
                pl.BlockSpec((Nb, C_in, L), lambda n: (n, 0, 0)),
                pl.BlockSpec((C_out, K * C_in), lambda n: (0, 0)),   # resident across the grid
                pl.BlockSpec((C_out, 1), lambda n: (0, 0)),
            ],
            out_specs=pl.BlockSpec((Nb, C_out, L), lambda n: (n, 0, 0)),
        ),
        compiler_params=pltpu.CompilerParams(
            dimension_semantics=("parallel",),
            vmem_limit_bytes=vmem_limit),
        cost_estimate=pl.CostEstimate(flops=flops, transcendentals=0,
                                      bytes_accessed=int(bytes_accessed)),
    )(x, w2, shift2)

    if n_pad != N:
        out = out[:N]
    return out


# ----------------------------------------------------------------------------- reference


def _reference(x, w, b, gamma, beta, run_mean, run_var, eps=1e-5, neg_slope=0.01):
    """Pure-JAX reference (lax conv) for a correctness check."""
    y = jax.lax.conv_general_dilated(
        x, w, window_strides=(1,), padding="SAME",
        dimension_numbers=("NCH", "OIH", "NCH"))
    y = y + b[None, :, None]
    scale = gamma / jnp.sqrt(run_var + eps)
    shift = beta - run_mean * scale
    y = y * scale[None, :, None] + shift[None, :, None]
    return jnp.where(y >= 0, y, neg_slope * y)


if __name__ == "__main__":
    # Small shapes consistent with the module: Conv1d over (batch, channels, length).
    N, C_in, C_out, L, K = 4, 4, 8, 128, 5

    key = jax.random.PRNGKey(0)
    kx, kw, kb, kg, kbe, km, kv = jax.random.split(key, 7)

    x = jax.random.normal(kx, (N, C_in, L), dtype=jnp.float32)

    # Deterministic synthetic parameters (shapes match nn.Conv1d / nn.BatchNorm1d).
    w = jax.random.normal(kw, (C_out, C_in, K), dtype=jnp.float32) * 0.2   # conv.weight
    b = jax.random.normal(kb, (C_out,), dtype=jnp.float32) * 0.1           # conv.bias
    gamma = 1.0 + 0.1 * jax.random.normal(kg, (C_out,), dtype=jnp.float32) # bn.weight
    beta = 0.1 * jax.random.normal(kbe, (C_out,), dtype=jnp.float32)       # bn.bias
    run_mean = 0.1 * jax.random.normal(km, (C_out,), dtype=jnp.float32)    # bn.running_mean
    run_var = jnp.abs(jax.random.normal(kv, (C_out,), dtype=jnp.float32)) + 0.5  # bn.running_var

    ref = _reference(x, w, b, gamma, beta, run_mean, run_var)

    # Full-precision path: tight check of the conv/BN/LeakyReLU math and the block planner.
    out_f32 = jax.block_until_ready(
        convolution_layer(x, w, b, gamma, beta, run_mean, run_var, compute_dtype=None))
    assert out_f32.shape == (N, C_out, L)
    assert jnp.allclose(out_f32, ref, atol=1e-4, rtol=1e-4), "f32 mismatch vs JAX reference"

    # Default bf16 I/O path (halved HBM traffic): loose check.
    out_bf16 = jax.block_until_ready(
        convolution_layer(x, w, b, gamma, beta, run_mean, run_var))
    assert out_bf16.shape == (N, C_out, L)
    assert out_bf16.dtype == jnp.bfloat16
    assert jnp.allclose(out_bf16.astype(jnp.float32), ref, atol=0.15, rtol=0.05), \
        "bf16 mismatch vs JAX reference"

    # Batch size that may not divide the chosen block (exercises the padding path on 2-TC chips).
    x5 = jax.random.normal(kx, (5, C_in, L), dtype=jnp.float32)
    ref5 = _reference(x5, w, b, gamma, beta, run_mean, run_var)
    out5 = jax.block_until_ready(
        convolution_layer(x5, w, b, gamma, beta, run_mean, run_var, compute_dtype=None))
    assert out5.shape == (5, C_out, L)
    assert jnp.allclose(out5, ref5, atol=1e-4, rtol=1e-4), "padded-batch mismatch vs reference"

    print("KERNEL_OK")
</pallas_src>

<mosaic_0001>
module attributes {stable_mosaic.version = 11 : i64} {
  func.func @_conv_bn_lrelu_kernel(%arg0: i32, %arg1: memref<2x4x128xf32, #tpu.memory_space<vmem>>, %arg2: memref<8x20xf32, #tpu.memory_space<vmem>>, %arg3: memref<8x1xf32, #tpu.memory_space<vmem>>, %arg4: memref<2x8x128xf32, #tpu.memory_space<vmem>>) attributes {dimension_semantics = [#tpu.dimension_semantics<parallel>], iteration_bounds = array<i64: 2>, scalar_prefetch = 0 : i64, scratch_operands = 0 : i64, tpu.core_type = #tpu.core_type<tc>, window_params = [{transform_indices = @transform_0, window_bounds = array<i64: 2, 4, 128>}, {pipeline_mode = #tpu.pipeline_mode<synchronous>, transform_indices = @transform_1, window_bounds = array<i64: 8, 20>}, {pipeline_mode = #tpu.pipeline_mode<synchronous>, transform_indices = @transform_2, window_bounds = array<i64: 8, 1>}, {transform_indices = @transform_3, window_bounds = array<i64: 2, 8, 128>}]} {
    %c0 = arith.constant 0 : index
    %c0_0 = arith.constant 0 : index
    %c0_1 = arith.constant 0 : index
    %0 = vector.load %arg1[%c0, %c0_0, %c0_1] : memref<2x4x128xf32, #tpu.memory_space<vmem>>, vector<1x4x128xf32>
    %1 = vector.shape_cast %0 : vector<1x4x128xf32> to vector<4x128xf32>
    %c1 = arith.constant 1 : index
    %c0_2 = arith.constant 0 : index
    %c0_3 = arith.constant 0 : index
    %2 = vector.load %arg1[%c1, %c0_2, %c0_3] : memref<2x4x128xf32, #tpu.memory_space<vmem>>, vector<1x4x128xf32>
    %3 = vector.shape_cast %2 : vector<1x4x128xf32> to vector<4x128xf32>
    %4 = tpu.concatenate %1, %3 in 1 : vector<4x128xf32>, vector<4x128xf32> -> vector<4x256xf32>
    %5 = tpu.iota {dimensions = array<i32: 1>} : vector<1x256xi32>
    %c128_i32 = arith.constant 128 : i32
    %c0_i32 = arith.constant 0 : i32
    %6 = arith.cmpi eq, %c128_i32, %c0_i32 : i32
    %c1_i32 = arith.constant 1 : i32
    %7 = arith.select %6, %c1_i32, %c128_i32 : i32
    %8 = vector.broadcast %7 : i32 to vector<1x256xi32>
    %9 = arith.remsi %5, %8 : vector<1x256xi32>
    %c0_i32_4 = arith.constant 0 : i32
    %10 = vector.broadcast %c0_i32_4 : i32 to vector<1x256xi32>
    %11 = arith.cmpi ne, %9, %10 : vector<1x256xi32>
    %c0_i32_5 = arith.constant 0 : i32
    %12 = vector.broadcast %c0_i32_5 : i32 to vector<1x256xi32>
    %13 = arith.cmpi slt, %9, %12 : vector<1x256xi32>
    %c0_i32_6 = arith.constant 0 : i32
    %14 = arith.cmpi slt, %7, %c0_i32_6 : i32
    %15 = vector.broadcast %14 : i1 to vector<1x256xi1>
    %16 = vector.broadcast %15 : vector<1x256xi1> to vector<1x256xi1>
    %17 = arith.xori %13, %16 : vector<1x256xi1>
    %18 = arith.andi %17, %11 : vector<1x256xi1>
    %19 = vector.broadcast %7 : i32 to vector<1x256xi32>
    %20 = arith.addi %9, %19 : vector<1x256xi32>
    %21 = arith.select %18, %20, %9 : vector<1x256xi1>, vector<1x256xi32>
    %c2_i32 = arith.constant 2 : i32
    %22 = tpu.dynamic_rotate %4 by %c2_i32 dim 1 : vector<4x256xf32>, i32 -> vector<4x256xf32>
    %c2_i32_7 = arith.constant 2 : i32
    %23 = vector.broadcast %c2_i32_7 : i32 to vector<1x256xi32>
    %24 = arith.cmpi sge, %21, %23 : vector<1x256xi32>
    %c0_i32_8 = arith.constant 0 : i32
    %25 = arith.sitofp %c0_i32_8 : i32 to f32
    %26 = vector.shape_cast %24 : vector<1x256xi1> to vector<1x256xi1>
    %27 = vector.broadcast %26 : vector<1x256xi1> to vector<4x256xi1>
    %28 = vector.broadcast %25 : f32 to vector<4x256xf32>
    %29 = arith.select %27, %22, %28 : vector<4x256xi1>, vector<4x256xf32>
    %c1_i32_9 = arith.constant 1 : i32
    %30 = tpu.dynamic_rotate %4 by %c1_i32_9 dim 1 : vector<4x256xf32>, i32 -> vector<4x256xf32>
    %c1_i32_10 = arith.constant 1 : i32
    %31 = vector.broadcast %c1_i32_10 : i32 to vector<1x256xi32>
    %32 = arith.cmpi sge, %21, %31 : vector<1x256xi32>
    %c0_i32_11 = arith.constant 0 : i32
    %33 = arith.sitofp %c0_i32_11 : i32 to f32
    %34 = vector.shape_cast %32 : vector<1x256xi1> to vector<1x256xi1>
    %35 = vector.broadcast %34 : vector<1x256xi1> to vector<4x256xi1>
    %36 = vector.broadcast %33 : f32 to vector<4x256xf32>
    %37 = arith.select %35, %30, %36 : vector<4x256xi1>, vector<4x256xf32>
    %c255_i32 = arith.constant 255 : i32
    %38 = tpu.dynamic_rotate %4 by %c255_i32 dim 1 : vector<4x256xf32>, i32 -> vector<4x256xf32>
    %c127_i32 = arith.constant 127 : i32
    %39 = vector.broadcast %c127_i32 : i32 to vector<1x256xi32>
    %40 = arith.cmpi slt, %21, %39 : vector<1x256xi32>
    %c0_i32_12 = arith.constant 0 : i32
    %41 = arith.sitofp %c0_i32_12 : i32 to f32
    %42 = vector.shape_cast %40 : vector<1x256xi1> to vector<1x256xi1>
    %43 = vector.broadcast %42 : vector<1x256xi1> to vector<4x256xi1>
    %44 = vector.broadcast %41 : f32 to vector<4x256xf32>
    %45 = arith.select %43, %38, %44 : vector<4x256xi1>, vector<4x256xf32>
    %c254_i32 = arith.constant 254 : i32
    %46 = tpu.dynamic_rotate %4 by %c254_i32 dim 1 : vector<4x256xf32>, i32 -> vector<4x256xf32>
    %c126_i32 = arith.constant 126 : i32
    %47 = vector.broadcast %c126_i32 : i32 to vector<1x256xi32>
    %48 = arith.cmpi slt, %21, %47 : vector<1x256xi32>
    %c0_i32_13 = arith.constant 0 : i32
    %49 = arith.sitofp %c0_i32_13 : i32 to f32
    %50 = vector.shape_cast %48 : vector<1x256xi1> to vector<1x256xi1>
    %51 = vector.broadcast %50 : vector<1x256xi1> to vector<4x256xi1>
    %52 = vector.broadcast %49 : f32 to vector<4x256xf32>
    %53 = arith.select %51, %46, %52 : vector<4x256xi1>, vector<4x256xf32>
    %54 = tpu.concatenate %29, %37, %4, %45, %53 in 0 : vector<4x256xf32>, vector<4x256xf32>, vector<4x256xf32>, vector<4x256xf32>, vector<4x256xf32> -> vector<20x256xf32>
    %c0_14 = arith.constant 0 : index
    %c0_15 = arith.constant 0 : index
    %55 = vector.load %arg2[%c0_14, %c0_15] : memref<8x20xf32, #tpu.memory_space<vmem>>, vector<8x20xf32>
    %cst = arith.constant dense<0.000000e+00> : vector<8x256xf32>
    %56 = tpu.matmul %55, %54, %cst {dimension_numbers = #tpu.dot_dimension_numbers<[1], [0], [0], [1], [0, 0, 1, 1], [], []>} : vector<8x20xf32>, vector<20x256xf32>, vector<8x256xf32> -> vector<8x256xf32>
    %c0_16 = arith.constant 0 : index
    %c0_17 = arith.constant 0 : index
    %57 = vector.load %arg3[%c0_16, %c0_17] : memref<8x1xf32, #tpu.memory_space<vmem>>, vector<8x1xf32>
    %58 = vector.broadcast %57 : vector<8x1xf32> to vector<8x256xf32>
    %59 = arith.addf %56, %58 : vector<8x256xf32>
    %cst_18 = arith.constant 0.000000e+00 : f32
    %60 = vector.broadcast %cst_18 : f32 to vector<8x256xf32>
    %61 = arith.cmpf oge, %59, %60 : vector<8x256xf32>
    %cst_19 = arith.constant 0.00999999977 : f32
    %62 = vector.broadcast %cst_19 : f32 to vector<8x256xf32>
    %63 = arith.mulf %62, %59 : vector<8x256xf32>
    %64 = arith.select %61, %59, %63 : vector<8x256xi1>, vector<8x256xf32>
    %65 = vector.extract_strided_slice %64 {offsets = [0, 0], sizes = [8, 128], strides = [1, 1]} : vector<8x256xf32> to vector<8x128xf32>
    %c0_20 = arith.constant 0 : index
    %c0_21 = arith.constant 0 : index
    %c0_22 = arith.constant 0 : index
    %66 = vector.load %arg4[%c0_20, %c0_21, %c0_22] : memref<2x8x128xf32, #tpu.memory_space<vmem>>, vector<1x8x128xf32>
    %67 = vector.shape_cast %66 : vector<1x8x128xf32> to vector<8x128xf32>
    %68 = vector.shape_cast %65 : vector<8x128xf32> to vector<1x8x128xf32>
    tpu.vector_store %arg4[%c0_20, %c0_21, %c0_22], %68 {strides = array<i32>} : memref<2x8x128xf32, #tpu.memory_space<vmem>>, vector<1x8x128xf32>,
    %69 = vector.extract_strided_slice %64 {offsets = [0, 128], sizes = [8, 128], strides = [1, 1]} : vector<8x256xf32> to vector<8x128xf32>
    %c1_23 = arith.constant 1 : index
    %c0_24 = arith.constant 0 : index
    %c0_25 = arith.constant 0 : index
    %70 = vector.load %arg4[%c1_23, %c0_24, %c0_25] : memref<2x8x128xf32, #tpu.memory_space<vmem>>, vector<1x8x128xf32>
    %71 = vector.shape_cast %70 : vector<1x8x128xf32> to vector<8x128xf32>
    %72 = vector.shape_cast %69 : vector<8x128xf32> to vector<1x8x128xf32>
    tpu.vector_store %arg4[%c1_23, %c0_24, %c0_25], %72 {strides = array<i32>} : memref<2x8x128xf32, #tpu.memory_space<vmem>>, vector<1x8x128xf32>,
    return
  }
  func.func @transform_0(%arg0: i32) -> (i32, i32, i32) {
    %c0_i32 = arith.constant 0 : i32
    %c0_i32_0 = arith.constant 0 : i32
    %c0_i32_1 = arith.constant 0 : i32
    return %arg0, %c0_i32, %c0_i32_0 : i32, i32, i32
  }
  func.func @transform_1(%arg0: i32) -> (i32, i32) {
    %c0_i32 = arith.constant 0 : i32
    %c0_i32_0 = arith.constant 0 : i32
    %c0_i32_1 = arith.constant 0 : i32
    return %c0_i32, %c0_i32_0 : i32, i32
  }
  func.func @transform_2(%arg0: i32) -> (i32, i32) {
    %c0_i32 = arith.constant 0 : i32
    %c0_i32_0 = arith.constant 0 : i32
    %c0_i32_1 = arith.constant 0 : i32
    return %c0_i32, %c0_i32_0 : i32, i32
  }
  func.func @transform_3(%arg0: i32) -> (i32, i32, i32) {
    %c0_i32 = arith.constant 0 : i32
    %c0_i32_0 = arith.constant 0 : i32
    %c0_i32_1 = arith.constant 0 : i32
    return %arg0, %c0_i32, %c0_i32_0 : i32, i32, i32
  }
}

</mosaic_0001>

<bundles_post_ra>
// kernel: tpu_custom_call.1
= control target key start
LH: loop header
LB: loop body
LE: loop exit
PB: predicated region body
PF: predicated region fallthrough
CT: control target
= control target key end

     0   :  { %8 = vsyncpa [#allocation3], 0  ;;  %s902_s0 = inlined_call_operand.hbm [shape: f32[4,4,128], index: 0, kind: input, shape index: {}]   ;;  %s903_s1 = inlined_call_operand.vmem [shape: f32[8,20], index: 1, kind: input, shape index: {}]   ;;  %s904_s2 = inlined_call_operand.vmem [shape: f32[8,1], index: 2, kind: input, shape index: {}]   ;;  %s905_s3 = inlined_call_operand.hbm [shape: f32[4,8,128], index: 3, kind: output, shape index: {}]  }
   0x1   :  { %10 = vsyncpa [#allocation3 + $0x1], 0 }
   0x2   :  { %11 = vsyncpa [#allocation4], 0 }
   0x3   :  { %13 = vsyncpa [#allocation4 + $0x1], 0  ;;  %s710_s12 = smov 0   ;;  %s712_s13 = smov 0  }
   0x4   :  { %s714_s14 = smov 0   ;;  %s716_s15 = smov 0  }
   0x5 LB: > { %s731_s16 = sadd.s32 4294967295, %s676_s15   ;;  %s482_s17 = sadd.s32 4294967294, %s676_s15   ;;  %s676_s15 = sphi %s716_s15, %s918_s15   ;;  %s672_s14 = sphi %s714_s14, %s917_s14   ;;  %s668_s13 = sphi %s712_s13, %s916_s13   ;;  %s664_s12 = sphi %s710_s12, %s915_s12  }
   0x6   : > { %s735_s18 = sadd.s32 1, %s676_s15   ;;  %s26_s19 = sadd.s32 1, %s672_s14 }
   0x7   : > { %s23_s20 = ssub.s32 %s676_s15, %s735_s18  ;;  %p33_p0 = scmp.ne.s32.totalorder %s672_s14, %s668_s13 }
   0x8   : > { %p24_p1 = scmp.eq.s32.totalorder %s23_s20, 0  ;;  %p34_p2 = scmp.eq.s32.totalorder %s676_s15, 0 }
   0x9   : > { %p39_p3 = scmp.ne.s32.totalorder %s668_s13, %s664_s12  ;;  %p40_p4 = scmp.eq.s32.totalorder %s731_s16, 0 }
   0xa   : > { %s747_s21 = scalar_select %p24_p1, %s672_s14, %s26_s19  }
   0xb   : > { %p749_p5 = por %p34_p2, %p33_p0  ;;  %p753_p6 = por %p40_p4, %p39_p3 }
   0xc   : > { %p105_p7 = scmp.eq.s32.totalorder %s731_s16, 1  ;;  %p111_p8 = scmp.eq.s32.totalorder %s482_s17, 1 }
   0xd   : > { %p519_p10 = scmp.lt.s32.totalorder %s676_s15, 2  ;;  %s137_s26 = sand.u32 1, %s672_s14  }
   0xe   : > { %p760_p11 = por %p105_p7, %p33_p0  ;;  %p764_p12 = por %p111_p8, %p39_p3 }
   0xf   : > { %s501_s27 = sshll.u32 %s676_s15, 7  ;;  %s485_s28 = sshll.u32 %s137_s26, 3 }
  0x10   : > { %s909_s24 = scalar_select %p760_p11, 1, 0 }
  0x11   : > { %s910_s25 = scalar_select %p764_p12, 1, 0 }
  0x12   : > { %s773_s4 = scalar_lea.hbm %s902_s0, %s501_s27  ;;  %s141_s5 = scalar_lea.vmem [#allocation2], %s485_s28 }
  0x13   : > { %s148_s6 = sshll.u32 %s141_s5, 4  ;;  %p777_p13 = pnand %p519_p10, %p749_p5  ;;  %s781_s6 = int_to_ptr.vmem [resolvable:$true] %s148_s6 }
  0x14   : > { %s783_s8 = scalar_lea.sflag [#allocation3], %s137_s26  ;;  %s580_s9 = scalar_lea.hbm %s773_s4, 128 }
  0x15   : > { %p581_p0 = scmp.ne.s32.totalorder %s773_s4, %s580_s9  ;;  %p582_p1 = pneg %p777_p13 }
  0x16   : > { %s585_s17 = scalar_lea.hbm %s902_s0, 256  ;;  %p586_p4 = scmp.lt.u32.totalorder %s773_s4, %s902_s0 }
  0x17   : > { %p583_p2 = pnand %p582_p1, %p581_p0  ;;  %p587_p5 = scmp.lt.u32.totalorder %s585_s17, %s580_s9 }
  0x18   : > { %p589_p8 = scmp.lt.u32.totalorder %s580_s9, %s773_s4 }
  0x19   : > { %p584_p3 = pneg %p583_p2  ;;  %p588_p7 = por %p587_p5, %p586_p4 }
  0x1b   : > { %p590_p10 = por %p589_p8, %p588_p7 }
  0x1d   : > { %p591_p9 = pnand %p590_p10, %p584_p3 }
  0x1f   : > { %594 = shalt.err (!%p591_p9)
}
  0x20   : > { %s595_s22 = scalar_lea.vmem %s781_s6, 128  ;;  %s678_s26 = smov [#allocation2]  }
  0x21   : > { %p596_p0 = scmp.ne.s32.totalorder %s781_s6, %s595_s22  ;;  %s600_s27 = sshll.u32 %s678_s26, 4  ;;  %s601_s27 = int_to_ptr.vmem [resolvable:$false] %s600_s27 }
  0x22   : > { %s602_s28 = scalar_lea.vmem %s601_s27, 256  ;;  %p603_p11 = scmp.lt.s32.totalorder %s781_s6, %s601_s27 }
  0x23   : > { %p598_p2 = pnand %p596_p0, %p582_p1  ;;  %p604_p4 = scmp.lt.s32.totalorder %s602_s28, %s595_s22 }
  0x25   : > { %p599_p12 = pneg %p598_p2  ;;  %p605_p5 = por %p604_p4, %p603_p11 }
  0x27   : > { %p606_p7 = pnand %p605_p5, %p599_p12 }
  0x29   : > { %609 = shalt.err (!%p606_p7)
}
  0x2a   : > { %s679_s29 = smov 64   ;;  %s680_s30 = smov 4  }
  0x2b   : > { %514 = dma.hbm_to_vmem [thread:$0]  (!%p777_p13), %s773_s4, 128, %s781_s6, %s783_s8, %s679_s29, %s679_s29, %s680_s30  }
  0x2c   : > { %p488_p9 = scmp.ge.s32.totalorder %s676_s15, 1  ;;  %p156_p1 = scmp.lt.s32.totalorder %s676_s15, 3 }
  0x2e   : > { %p157_p3 = pnand %p488_p9, %p156_p1 }
  0x2f   : > { %s814_s5 = sand.u32 (!%p157_p3), 1, %s668_s13  }
  0x30   : > { %160 = sbr.rel (%p157_p3) target bundleno = 426 (0x1aa), region = 32  ;;  %s489_s9 = sshll.u32 (!%p157_p3), %s814_s5, 3 }
  0x31   : > { %s163_s10 = scalar_lea.sflag (!%p157_p3), [#allocation3], %s814_s5  ;;  %s166_s11 = scalar_lea.vmem (!%p157_p3), [#allocation2], %s489_s9 }
  0x37   : > { %655 = dma.done.wait (%p753_p6), %s163_s10, 128  }
  0x38   : > { %657 = vsyncadd (%p753_p6), %s163_s10, 4294967168  ;;  %v822_v0 = vld [vmem:[%s166_s11] sm:$0xf]  ;;  %v824_v1 = vld [vmem:[%s166_s11 + $0x4] sm:$0xf]  ;;  %s681_s4 = smov 1   ;;  %v194_v6 = vlaneseq }
  0x39   : > { %v563_v2 = vpack.i.bf16 %v824_v1, %v822_v0  ;;  %s682_s6 = smov 2   ;;  %s683_s7 = smov 127   ;;  %v685_v3 = vmov 0.0   ;;  %v299_v4 = vld [vmem:[%s904_s2] sm:$0xff]  ;;  %v686_v5 = vmov 0   ;;  %vm293_vm8 = vcmask 1043456  }
  0x3a   : > { %s684_s8 = smov 126   ;;  %379 = vmatprep.mubr.f32.mxu0 %v685_v3  ;;  %578 = vset.pattern.permute.xlu1 %v686_v5  ;;  %v195_v7 = vand.u32 127, %v194_v6  ;;  %v298_v47 = vld [vmem:[%s903_s1] sm:$0xff]  ;;  %vm305_vm11 = vcmask 162816   ;;  %s490_s22 = sshll.u32 %s814_s5, 4 }
  0x3b   : > { %564 = vrot.lane.b32.xlu0 %v563_v2, %s681_s4  ;;  %574 = vrot.lane.b32.xlu1 %v563_v2, %s682_s6  ;;  %s188_s26 = scalar_lea.vmem [#allocation5], %s490_s22  ;;  %s502_s28 = sshll.u32 %s731_s16, 8 }
  0x3c   : > { %579 = vset.pattern.permute.xlu0 %v686_v5  ;;  %v196_v8 = vadd.s32 128, %v195_v7  ;;  %vm240_vm0 = vcmp.lt.s32.totalorder %v195_v7, 1  ;;  %vm243_vm2 = vcmp.ge.s32.totalorder %v195_v7, 1  ;;  %vm225_vm3 = vcmp.lt.s32.totalorder %v195_v7, 2  ;;  %s409_s27 = sshll.u32 %s188_s26, 4  ;;  %s858_s9 = scalar_lea.hbm %s905_s3, %s502_s28  ;;  %s853_s27 = int_to_ptr.vmem [resolvable:$true] %s409_s27 }
  0x3d   : > { %vm255_vm4 = vcmp.lt.s32.totalorder %v195_v7, 127  ;;  %vm228_vm5 = vcmp.ge.s32.totalorder %v195_v7, 2  ;;  %vm270_vm9 = vcmp.lt.s32.totalorder %v195_v7, 126  ;;  %s396_s16 = scalar_lea.sflag [#allocation4], %s814_s5  ;;  %s610_s10 = scalar_lea.vmem %s853_s27, 256 }
  0x3e   : > { %v208_v9 = vand.u32 127, %v196_v8  ;;  %p611_p6 = scmp.ne.s32.totalorder %s853_s27, %s610_s10  ;;  %p912_p11 = scmp.ne.s32.totalorder %s909_s24, 0 }
  0x3f   : > { %569 = vrot.lane.b32.xlu0 %v563_v2, %s683_s7  ;;  %266 = vrot.lane.b32.xlu1 %v822_v0, %s684_s8  ;;  %s687_s11 = smov [#allocation5]  }
  0x40   : > { %vm244_vm1 = vcmp.ge.s32.totalorder %v208_v9, 1  ;;  %vm229_vm6 = vcmp.ge.s32.totalorder %v208_v9, 2  ;;  %vm259_vm7 = vcmp.lt.s32.totalorder %v208_v9, 127  ;;  %vm274_vm10 = vcmp.lt.s32.totalorder %v208_v9, 126  ;;  %p612_p12 = pnand %p611_p6, %p912_p11  ;;  %s614_s4 = sshll.u32 %s687_s11, 4  ;;  %s615_s4 = int_to_ptr.vmem [resolvable:$false] %s614_s4 }
  0x41   : > { %s616_s6 = scalar_lea.vmem %s615_s4, 512  ;;  %p617_p8 = scmp.lt.s32.totalorder %s853_s27, %s615_s4 }
  0x42   : > { %p613_p13 = pneg %p612_p12  ;;  %p618_p10 = scmp.lt.s32.totalorder %s616_s6, %s610_s10 }
  0x43   : > { %268 = vrot.lane.b32.xlu0 %v824_v1, %s684_s8  ;;  %302 = vperm.xlu1 %578, %v299_v4  }
  0x44   : > { %p619_p0 = por %p618_p10, %p617_p8 }
  0x46   : > { %p620_p2 = pnand %p619_p0, %p613_p13 }
  0xad   : > { %v565_v10 = vpop.permute.xlu0 %564  ;;  %v575_v11 = vpop.permute.xlu1 %574 }
  0xae   : > { %v567_v12 = vunpack.i.h.bf16 %v565_v10  ;;  %v566_v13 = vunpack.i.l.bf16 %v565_v10  ;;  %v577_v14 = vunpack.i.h.bf16 %v575_v11  ;;  %v576_v15 = vunpack.i.l.bf16 %v575_v11 }
  0xb0   : > { %v241_v16 = vsel %vm240_vm0, %v566_v13, %v567_v12  ;;  %v242_v17 = vsel %vm240_vm0, %v567_v12, %v566_v13  ;;  %v226_v23 = vsel %vm225_vm3, %v576_v15, %v577_v14  ;;  %v227_v24 = vsel %vm225_vm3, %v577_v14, %v576_v15 }
  0xb1   : > { %v570_v18 = vpop.permute.xlu0 %569  ;;  %v250_v19 = vsel %vm244_vm1, %v241_v16, 0.0  ;;  %v249_v20 = vsel %vm243_vm2, %v242_v17, 0.0  ;;  %v267_v28 = vpop.permute.xlu1 %266  ;;  %v235_v30 = vsel %vm229_vm6, %v226_v23, 0.0  ;;  %v234_v33 = vsel %vm228_vm5, %v227_v24, 0.0 }
  0xb2   : > { %v572_v21 = vunpack.i.h.bf16 %v570_v18  ;;  %v571_v22 = vunpack.i.l.bf16 %v570_v18  ;;  %v284_v27 = vrot.slane %v250_v19, 4  ;;  %v283_v29 = vrot.slane %v249_v20, 4 }
  0xb4   : > { %v256_v25 = vsel %vm255_vm4, %v571_v22, %v572_v21  ;;  %v257_v26 = vsel %vm255_vm4, %v572_v21, %v571_v22  ;;  %v295_v38 = vsel %vm293_vm8, %v235_v30, %v284_v27  ;;  %v294_v40 = vsel %vm293_vm8, %v234_v33, %v283_v29 }
  0xb5   : > { %v265_v31 = vsel %vm259_vm7, %v257_v26, 0.0  ;;  %v269_v32 = vpop.permute.xlu0 %268  ;;  %v264_v34 = vsel %vm255_vm4, %v256_v25, 0.0 }
  0xb6   : > { %v290_v35 = vrot.slane %v265_v31, 4  ;;  %v289_v36 = vrot.slane %v264_v34, 4  ;;  %v272_v37 = vsel %vm270_vm9, %v269_v32, %v267_v28  ;;  %v271_v44 = vsel %vm270_vm9, %v267_v28, %v269_v32 }
  0xb7   : > { %v280_v45 = vsel %vm274_vm10, %v272_v37, 0.0  ;;  %v279_v46 = vsel %vm270_vm9, %v271_v44, 0.0 }
  0xb8   : > { %v297_v39 = vsel %vm293_vm8, %v824_v1, %v290_v35  ;;  %v296_v41 = vsel %vm293_vm8, %v822_v0, %v289_v36 }
  0xb9   : > { %v503_v42 = vpack.c.bf16 %v297_v39, %v295_v38  ;;  %v505_v43 = vpack.c.bf16 %v296_v41, %v294_v40 }
  0xbb   : > { %504 = vmatprep.subr.bf16.mxu0 %v503_v42 }
  0xbc   : > { %506 = vmatpush1.bf16.msra.mxu0 %v505_v43 }
  0xbd   : > { %492 = vmatprep.subr.msk.mxu0 %vm293_vm8, %v280_v45 }
  0xc0   : > { %493 = vmatpush1.msk.msra.mxu0 %vm293_vm8, %v279_v46 }
  0xc1   : > { %494 = vmatmul.mubr.msk.f32.vlgmr.msra.gmra.mrb[0].mxu0 %vm305_vm11, %v298_v47 }
  0xc2   : > { %v303_v48 = vpop.permute.xlu1 %302 }
 0x194   : > { %v381_v49 = vpop.f32.mrb[0].mxu0 }
 0x195   : > { %v382_v50 = vadd.f32 %v381_v49, %v303_v48  ;;  %v383_v51 = vpop.f32.mrb[1].mxu0 }
 0x196   : > { %v384_v52 = vadd.f32 %v383_v51, %v303_v48 }
 0x197   : > { %vm386_vm12 = vcmp.ge.f32.partialorder %v382_v50, 0.0  ;;  %v388_v53 = vmul.f32 0.01, %v382_v50 }
 0x198   : > { %vm387_vm13 = vcmp.ge.f32.partialorder %v384_v52, 0.0  ;;  %v389_v54 = vmul.f32 0.01, %v384_v52 }
 0x199   : > { %v390_v55 = vsel %vm386_vm12, %v382_v50, %v388_v53 }
 0x19a   : > { %392 = vst [vmem:[%s188_s26] sm:$0xff] %v390_v55  ;;  %v391_v56 = vsel %vm387_vm13, %v384_v52, %v389_v54 }
 0x19b   : > { %495 = vst [vmem:[%s188_s26 + $0x8] sm:$0xff] %v391_v56 }
 0x19c   : > { %623 = shalt.err (!%p620_p2)
}
 0x19d   : > { %s624_s7 = scalar_lea.hbm %s858_s9, 256  ;;  %s628_s17 = scalar_lea.hbm %s905_s3, 512 }
 0x19e   : > { %p625_p4 = scmp.ne.s32.totalorder %s858_s9, %s624_s7  ;;  %p629_p9 = scmp.lt.u32.totalorder %s858_s9, %s905_s3 }
 0x19f   : > { %p630_p1 = scmp.lt.u32.totalorder %s628_s17, %s624_s7  ;;  %p632_p6 = scmp.lt.u32.totalorder %s624_s7, %s858_s9 }
 0x1a0   : > { %p626_p5 = pnand %p625_p4, %p912_p11 }
 0x1a1   : > { %p631_p3 = por %p630_p1, %p629_p9 }
 0x1a2   : > { %p627_p7 = pneg %p626_p5 }
 0x1a3   : > { %p633_p12 = por %p632_p6, %p631_p3 }
 0x1a5   : > { %p634_p13 = pnand %p633_p12, %p627_p7 }
 0x1a7   : > { %637 = shalt.err (!%p634_p13)
}
 0x1a8   : > { %s688_s22 = smov 128   ;;  %s689_s26 = smov 8  }
 0x1a9   : > { %509 = dma.vmem_to_hbm [thread:$0]  (%p912_p11), %s853_s27, 256, %s858_s9, %s396_s16, %s688_s22, %s688_s22, %s689_s26  }
 0x1aa PF: > { %s424_s28 = sand.u32 1, %s664_s12   ;;  %p913_p8 = scmp.ne.s32.totalorder %s910_s25, 0 }
 0x1ab   : > { %p914_p10 = scmp.ge.s32.totalorder %s676_s15, 2  ;;  %s425_s29 = scalar_lea.sflag [#allocation4], %s424_s28 }
 0x1ad   : > { %p516_p0 = pnand %p914_p10, %p913_p8 }
 0x1af   : > { %659 = dma.done.wait (!%p516_p0), %s425_s29, 256  }
 0x1b0   : > { %661 = vsyncadd (!%p516_p0), %s425_s29, 4294967040  ;;  %p16_p2 = scmp.ge.s32.totalorder %s735_s18, 4   ;;  %s915_s12 = smov %s668_s13 }
 0x1b1   : > { %s916_s13 = smov %s672_s14  ;;  %s917_s14 = smov %s747_s21 }
 0x1b2   : > { %s918_s15 = smov %s735_s18  ;;  %18 = sbr.rel (!%p16_p2) target bundleno = 5 (0x5), region = 79 }
 0x1b9   :  { %430 = vsyncpa [#allocation3], 1 }
 0x1ba   :  { %432 = vsyncpa [#allocation3 + $0x1], 1 }
 0x1bb   :  { %433 = vsyncpa [#allocation4], 1 }
 0x1bc   :  { %435 = vsyncpa [#allocation4 + $0x1], 1 }

</bundles_post_ra>
